<compile_context>
chip_gen: v5e
topology: v5e:2x2
jax: 0.10.0
libtpu: 0.0.40
codegen_flags: <defaults>
</compile_context>

<pallas_src>
import jax
import jax.numpy as jnp
from jax.experimental import pallas as pl
from jax.experimental.pallas import tpu as pltpu

LANE = 128     # vreg lane width
SUBLANE = 8    # f32 sublane count


def _round_up(n, m):
    return ((n + m - 1) // m) * m


def _qnet_kernel(x_ref, w1_ref, b1_ref, w2_ref, b2_ref, out_ref):
    # hidden = relu(x @ W1 + b1)
    h = jnp.dot(x_ref[...], w1_ref[...], preferred_element_type=jnp.float32)
    h = jnp.maximum(h + b1_ref[...], 0.0)          # b1 is (1, Hp) -> broadcasts
    # out = hidden @ W2 + b2
    o = jnp.dot(h, w2_ref[...], preferred_element_type=jnp.float32)
    out_ref[...] = (o + b2_ref[...]).astype(out_ref.dtype)


def init_params(key, input_size, hidden_size, output_size):
    """Deterministic init matching nn.Linear's U(-1/sqrt(fan_in), 1/sqrt(fan_in)).

    Weights are stored [in, out] (transpose of PyTorch's [out, in]) so the
    kernel computes x @ W directly.
    """
    k1, k2, k3, k4 = jax.random.split(key, 4)
    lim1 = 1.0 / jnp.sqrt(jnp.float32(input_size))
    lim2 = 1.0 / jnp.sqrt(jnp.float32(hidden_size))
    w1 = jax.random.uniform(k1, (input_size, hidden_size), jnp.float32, -lim1, lim1)
    b1 = jax.random.uniform(k2, (hidden_size,), jnp.float32, -lim1, lim1)
    w2 = jax.random.uniform(k3, (hidden_size, output_size), jnp.float32, -lim2, lim2)
    b2 = jax.random.uniform(k4, (output_size,), jnp.float32, -lim2, lim2)
    return w1, b1, w2, b2


def pad_params(w1, b1, w2, b2):
    """Zero-pad parameters ONCE (do not repeat per call).

    * Input feature dim stays at its logical size (x is never padded).
    * Hidden dim padded to lane width (128) so the intermediate is lane-dense.
    * Output dim padded only to the sublane width (8) — small writeback DMA.
    Zero pads contribute exactly 0 to the result.
    """
    F, H = w1.shape
    O = w2.shape[1]
    Hp = _round_up(H, LANE)        # 32  -> 128
    Op = _round_up(O, SUBLANE)     # 3   -> 8
    w1p = jnp.zeros((F, Hp), jnp.float32).at[:, :H].set(w1)
    b1p = jnp.zeros((1, Hp), jnp.float32).at[0, :H].set(b1)
    w2p = jnp.zeros((Hp, Op), jnp.float32).at[:H, :O].set(w2)
    b2p = jnp.zeros((1, Op), jnp.float32).at[0, :O].set(b2)
    return w1p, b1p, w2p, b2p


def linear_qnet_forward(x, w1p, b1p, w2p, b2p, output_size, *,
                        small_batch_max=2048, batch_tile=1024):
    """Forward pass with padded params (from pad_params).

    x: [B, input_size] f32 (unpadded).  Returns [B, output_size] f32.
    """
    B, F = x.shape
    Fw, Hp = w1p.shape
    assert F == Fw, "x feature dim must match W1"
    Op = w2p.shape[1]
    dtype = jnp.float32

    # Advisory estimate from the actual shapes the kernel touches.
    cost = pl.CostEstimate(
        flops=2 * B * (F * Hp + Hp * Op),
        transcendentals=0,
        bytes_accessed=4 * (B * F + F * Hp + Hp + Hp * Op + Op + B * Op),
    )

    if B <= small_batch_max:
        # ---- small / medium batch: gridless, whole arrays resident in VMEM.
        # No batch padding, no pipeline machinery, single dispatch.
        out = pl.pallas_call(
            _qnet_kernel,
            out_shape=jax.ShapeDtypeStruct((B, Op), dtype),
            in_specs=[pl.BlockSpec(memory_space=pltpu.MemorySpace.VMEM)] * 5,
            out_specs=pl.BlockSpec(memory_space=pltpu.MemorySpace.VMEM),
            cost_estimate=cost,
        )(x, w1p, b1p, w2p, b2p)
        return out[:, :output_size]

    # ---- large batch: tile the batch over a parallel grid axis --------------
    # Cap the tile so the grid keeps >= ~4 steps (keeps both v7x TCs busy);
    # weights/biases stay VMEM-resident across steps, x/out tiles pipeline.
    TB = min(batch_tile, _round_up((B + 3) // 4, SUBLANE))
    Bp = _round_up(B, TB)
    xp = x if Bp == B else jnp.zeros((Bp, F), dtype).at[:B].set(x)
    out = pl.pallas_call(
        _qnet_kernel,
        out_shape=jax.ShapeDtypeStruct((Bp, Op), dtype),
        grid_spec=pltpu.PrefetchScalarGridSpec(
            num_scalar_prefetch=0,
            grid=(Bp // TB,),
            in_specs=[
                pl.BlockSpec((TB, F), lambda i: (i, 0)),    # x tile marches
                pl.BlockSpec((F, Hp), lambda i: (0, 0)),    # weights resident
                pl.BlockSpec((1, Hp), lambda i: (0, 0)),
                pl.BlockSpec((Hp, Op), lambda i: (0, 0)),
                pl.BlockSpec((1, Op), lambda i: (0, 0)),
            ],
            out_specs=pl.BlockSpec((TB, Op), lambda i: (i, 0)),
        ),
        compiler_params=pltpu.CompilerParams(
            dimension_semantics=("parallel",),              # megacore on v7x
        ),
        cost_estimate=cost,
    )(xp, w1p, b1p, w2p, b2p)
    if Bp != B:
        out = out[:B]
    return out[:, :output_size]


# TODO(synk): Linear_QNet.save() (torch.save checkpoint I/O) has no kernel
# equivalent; checkpointing is host-side and out of scope here.
# TODO(synk): if the caller only ever needs the greedy action, an argmax over
# the 3 logits could be fused into the kernel epilogue to save a dispatch per
# env step; kept as logits here to match the module's forward semantics.


if __name__ == "__main__":
    # Snake Q-net sizes: 11 state features, 3 actions, small hidden layer.
    input_size, hidden_size, output_size = 11, 32, 3

    key = jax.random.PRNGKey(0)
    kx1, kx2, kp = jax.random.split(key, 3)
    w1, b1, w2, b2 = init_params(kp, input_size, hidden_size, output_size)
    w1p, b1p, w2p, b2p = pad_params(w1, b1, w2, b2)   # pad once, reuse every call

    def ref_fwd(x):
        return jnp.maximum(x @ w1 + b1, 0.0) @ w2 + b2

    # 1) Tiny batch (single env step style) -> gridless whole-array-VMEM path.
    x_small = jax.random.normal(kx1, (5, input_size), jnp.float32)
    out_small = linear_qnet_forward(x_small, w1p, b1p, w2p, b2p, output_size)
    out_small = jax.block_until_ready(out_small)
    assert out_small.shape == (5, output_size)
    assert jnp.allclose(out_small, ref_fwd(x_small), atol=1e-5, rtol=1e-5)

    # 2) Large replay-minibatch style batch -> batch-tiled parallel-grid path.
    x_large = jax.random.normal(kx2, (4096, input_size), jnp.float32)
    out_large = linear_qnet_forward(x_large, w1p, b1p, w2p, b2p, output_size)
    out_large = jax.block_until_ready(out_large)
    assert out_large.shape == (4096, output_size)
    assert jnp.allclose(out_large, ref_fwd(x_large), atol=1e-5, rtol=1e-5)

    print("KERNEL_OK")
</pallas_src>

<mosaic_0001>
module attributes {stable_mosaic.version = 11 : i64} {
  func.func @_qnet_kernel(%arg0: memref<5x11xf32, #tpu.memory_space<vmem>>, %arg1: memref<11x128xf32, #tpu.memory_space<vmem>>, %arg2: memref<1x128xf32, #tpu.memory_space<vmem>>, %arg3: memref<128x8xf32, #tpu.memory_space<vmem>>, %arg4: memref<1x8xf32, #tpu.memory_space<vmem>>, %arg5: memref<5x8xf32, #tpu.memory_space<vmem>>) attributes {dimension_semantics = [], scalar_prefetch = 0 : i64, scratch_operands = 0 : i64, tpu.core_type = #tpu.core_type<tc>} {
    %c0 = arith.constant 0 : index
    %c0_0 = arith.constant 0 : index
    %0 = vector.load %arg0[%c0, %c0_0] : memref<5x11xf32, #tpu.memory_space<vmem>>, vector<5x11xf32>
    %c0_1 = arith.constant 0 : index
    %c0_2 = arith.constant 0 : index
    %1 = vector.load %arg1[%c0_1, %c0_2] : memref<11x128xf32, #tpu.memory_space<vmem>>, vector<11x128xf32>
    %cst = arith.constant dense<0.000000e+00> : vector<5x128xf32>
    %2 = tpu.matmul %0, %1, %cst {dimension_numbers = #tpu.dot_dimension_numbers<[1], [0], [0], [1], [0, 0, 1, 1], [], []>} : vector<5x11xf32>, vector<11x128xf32>, vector<5x128xf32> -> vector<5x128xf32>
    %c0_3 = arith.constant 0 : index
    %c0_4 = arith.constant 0 : index
    %3 = vector.load %arg2[%c0_3, %c0_4] : memref<1x128xf32, #tpu.memory_space<vmem>>, vector<1x128xf32>
    %4 = vector.broadcast %3 : vector<1x128xf32> to vector<5x128xf32>
    %5 = arith.addf %2, %4 : vector<5x128xf32>
    %cst_5 = arith.constant 0.000000e+00 : f32
    %6 = vector.broadcast %cst_5 : f32 to vector<5x128xf32>
    %7 = arith.maximumf %5, %6 : vector<5x128xf32>
    %c0_6 = arith.constant 0 : index
    %c0_7 = arith.constant 0 : index
    %8 = vector.load %arg3[%c0_6, %c0_7] : memref<128x8xf32, #tpu.memory_space<vmem>>, vector<128x8xf32>
    %cst_8 = arith.constant dense<0.000000e+00> : vector<5x8xf32>
    %9 = tpu.matmul %7, %8, %cst_8 {dimension_numbers = #tpu.dot_dimension_numbers<[1], [0], [0], [1], [0, 0, 1, 1], [], []>} : vector<5x128xf32>, vector<128x8xf32>, vector<5x8xf32> -> vector<5x8xf32>
    %c0_9 = arith.constant 0 : index
    %c0_10 = arith.constant 0 : index
    %10 = vector.load %arg4[%c0_9, %c0_10] : memref<1x8xf32, #tpu.memory_space<vmem>>, vector<1x8xf32>
    %11 = vector.broadcast %10 : vector<1x8xf32> to vector<5x8xf32>
    %12 = arith.addf %9, %11 : vector<5x8xf32>
    %c0_11 = arith.constant 0 : index
    %c0_12 = arith.constant 0 : index
    %13 = vector.load %arg5[%c0_11, %c0_12] : memref<5x8xf32, #tpu.memory_space<vmem>>, vector<5x8xf32>
    tpu.vector_store %arg5[%c0_11, %c0_12], %12 {strides = array<i32>} : memref<5x8xf32, #tpu.memory_space<vmem>>, vector<5x8xf32>,
    return
  }
}

</mosaic_0001>

<bundles_post_ra>
// kernel: tpu_custom_call.1
= control target key start
LH: loop header
LB: loop body
LE: loop exit
PB: predicated region body
PF: predicated region fallthrough
CT: control target
= control target key end

     0   :  { %vm32_vm0 = vcmask 1042432   ;;  %vm28_vm1 = vcmask 89088   ;;  %s243_s0 = inlined_call_operand.vmem [shape: f32[5,11], index: 0, kind: input, shape index: {}]   ;;  %s244_s1 = inlined_call_operand.vmem [shape: f32[11,128], index: 1, kind: input, shape index: {}]   ;;  %s245_s2 = inlined_call_operand.vmem [shape: f32[1,128], index: 2, kind: input, shape index: {}]   ;;  %s246_s3 = inlined_call_operand.vmem [shape: f32[128,8], index: 3, kind: input, shape index: {}]   ;;  %s247_s4 = inlined_call_operand.vmem [shape: f32[1,8], index: 4, kind: input, shape index: {}]   ;;  %s248_s5 = inlined_call_operand.hbm [shape: f32[5,8], index: 5, kind: output, shape index: {}]  }
   0x1   :  { %v23_v0 = vld [vmem:[%s244_s1 + $0x8] sm:$0x7]  ;;  %v22_v1 = vld [vmem:[%s244_s1] sm:$0xff]  ;;  %v72_v3 = vld [vmem:[%s246_s3 + $0x78] sm:$0xff] }
   0x2   :  { %115 = vmatpush.msk.msra.mxu0 %vm32_vm0, %v23_v0  ;;  %v21_v2 = vld [vmem:[%s243_s0] sm:$0x1f]  ;;  %v71_v4 = vld [vmem:[%s246_s3 + $0x70] sm:$0xff]  ;;  %77 = vmatpush.msra.mxu1 %v72_v3  ;;  %v70_v5 = vld [vmem:[%s246_s3 + $0x68] sm:$0xff] }
   0x3   :  { %v69_v6 = vld [vmem:[%s246_s3 + $0x60] sm:$0xff] }
   0x4   :  { %51 = vmatpush.msra.mxu0 %v22_v1  ;;  %78 = vmatpush.msra.mxu1 %v71_v4 }
   0x5   :  { %116 = vmatmul.msk.f32.vlgmr.msra.gmra.mxu0 %vm28_vm1, %v21_v2 }
   0x6   :  { %79 = vmatpush.msra.mxu1 %v70_v5 }
   0x7   :  { %10 = vsyncpa [#allocation3], 0  ;;  %v68_v7 = vld [vmem:[%s246_s3 + $0x58] sm:$0xff]  ;;  %v67_v8 = vld [vmem:[%s246_s3 + $0x50] sm:$0xff]  ;;  %s146_s6 = smov [#allocation2]   ;;  %s106_s10 = sshll.u32 %s248_s5, 4  ;;  %s107_s10 = int_to_ptr.hbm [resolvable:$true] %s106_s10 }
   0x8   :  { %80 = vmatpush.msra.mxu1 %v69_v6  ;;  %v66_v9 = vld [vmem:[%s246_s3 + $0x48] sm:$0xff]  ;;  %v65_v10 = vld [vmem:[%s246_s3 + $0x40] sm:$0xff]  ;;  %v64_v11 = vld [vmem:[%s246_s3 + $0x38] sm:$0xff]  ;;  %s104_s7 = sshll.u32 %s146_s6, 4  ;;  %vm97_vm2 = vcmask 61440   ;;  %s105_s7 = int_to_ptr.vmem [resolvable:$true] %s104_s7 }
   0x9   :  { %v63_v12 = vld [vmem:[%s246_s3 + $0x30] sm:$0xff]  ;;  %v62_v13 = vld [vmem:[%s246_s3 + $0x28] sm:$0xff]  ;;  %v61_v14 = vld [vmem:[%s246_s3 + $0x20] sm:$0xff] }
   0xa   :  { %81 = vmatpush.msra.mxu1 %v68_v7  ;;  %v60_v15 = vld [vmem:[%s246_s3 + $0x18] sm:$0xff]  ;;  %v59_v16 = vld [vmem:[%s246_s3 + $0x10] sm:$0xff]  ;;  %v58_v17 = vld [vmem:[%s246_s3 + $0x8] sm:$0xff] }
   0xb   :  { %v57_v18 = vld [vmem:[%s246_s3] sm:$0xff] }
   0xc   :  { %82 = vmatpush.msra.mxu1 %v67_v8  ;;  %v118_v19 = vld [vmem:[%s245_s2] ss:$0 sm:$0xff] }
   0xd   :  { %v119_v23 = vld [vmem:[%s247_s4] ss:$0 sm:$0xff] }
   0xe   :  { %83 = vmatpush.msra.mxu1 %v66_v9 }
  0x10   :  { %84 = vmatpush.msra.mxu1 %v65_v10 }
  0x12   :  { %85 = vmatpush.msra.mxu1 %v64_v11 }
  0x14   :  { %86 = vmatpush.msra.mxu1 %v63_v12 }
  0x16   :  { %87 = vmatpush.msra.mxu1 %v62_v13 }
  0x18   :  { %88 = vmatpush.msra.mxu1 %v61_v14 }
  0x1a   :  { %89 = vmatpush.msra.mxu1 %v60_v15 }
  0x1c   :  { %90 = vmatpush.msra.mxu1 %v59_v16 }
  0x1e   :  { %91 = vmatpush.msra.mxu1 %v58_v17 }
  0x20   :  { %92 = vmatpush.msra.mxu1 %v57_v18 }
  0x82   :  { %v53_v20 = vpop.f32.mrf.mxu0 }
  0x83   :  { %v54_v21 = vadd.f32 %v118_v19, %v53_v20 }
  0x85   :  { %v56_v22 = vmax.f32 %v54_v21, 0.0 }
  0x87   :  { %93 = vmatmul.f32.vlgmr.msra.gmra.mxu1 %v56_v22 }
 0x104   :  { %v94_v24 = vpop.f32.mrf.mxu1 }
 0x105   :  { %v95_v25 = vadd.f32 %v119_v23, %v94_v24 }
 0x107   :  { %98 = vst.msk [vmem:[#allocation2] sm:$0x1f] %vm97_vm2, %v95_v25 }
 0x108   :  { %109 = dma.vmem_to_hbm [thread:$0]  %s105_s7, 128, %s107_s10, [#allocation3]  }
 0x109   :  { %144 = dma.done.wait [#allocation3], 128  }
 0x10a   :  { %145 = vsyncadd [#allocation3], 4294967168 }
 0x10b   :  { %114 = vsyncpa [#allocation3], 1 }

</bundles_post_ra>
